<compile_context>
chip_gen: v7x
topology: tpu7x:2x2x1
jax: 0.10.0
libtpu: 0.0.40
codegen_flags: <defaults>
</compile_context>

<pallas_src>
import functools

import jax
import jax.numpy as jnp
from jax.experimental import pallas as pl
from jax.experimental.pallas import tpu as pltpu


def _round_up(x, m):
    return (x + m - 1) // m * m


def _mlp_kernel(x_ref, w1_ref, b1_ref, w2_ref, b2_ref, out_ref, *, apply_softmax):
    # In-kernel cast of the activation tile to the matmul dtype (no-op for f32);
    # avoids an extra wrapper-side HBM pass over x.
    x = x_ref[...].astype(w1_ref.dtype)
    # fc1: (tB, D_in) @ (D_in, H) on the MXU with f32 accumulation.
    h = jnp.dot(x, w1_ref[...], preferred_element_type=jnp.float32)
    h = jnp.maximum(h + b1_ref[...], 0.0)                 # bias + ReLU in f32 (VPU)
    # fc2: (tB, H) @ (H, D_out) -> narrow logits, f32 accumulation.
    o = jnp.dot(h.astype(w2_ref.dtype), w2_ref[...],
                preferred_element_type=jnp.float32)
    o = o + b2_ref[...]
    if apply_softmax:
        # Numerically stable softmax over exactly D_out columns; exact division
        # for parity with PyTorch F.softmax (cost is negligible at this width).
        m = jnp.max(o, axis=-1, keepdims=True)
        e = jnp.exp(o - m)
        o = e / jnp.sum(e, axis=-1, keepdims=True)
    out_ref[...] = o.astype(out_ref.dtype)                # narrow (tB, D_out) store


def prepare_mlp_params(w1, b1, w2, b2, *, matmul_dtype=jnp.bfloat16):
    """One-time weight prep (outside the hot path).

    w1: (H, D_in), b1: (H,), w2: (D_out, H), b2: (D_out,) -- PyTorch nn.Linear layout.
    Returns weights transposed to (in, out) and cast to the matmul dtype; biases kept
    in f32 as (1, features) rows. No feature padding (outputs stay narrow).
    """
    H, D_in = w1.shape
    D_out = w2.shape[0]
    del D_in, D_out
    w1_t = jnp.asarray(w1, jnp.float32).T.astype(matmul_dtype)   # (D_in, H)
    w2_t = jnp.asarray(w2, jnp.float32).T.astype(matmul_dtype)   # (H, D_out)
    b1_2d = jnp.asarray(b1, jnp.float32).reshape(1, H)
    b2_2d = jnp.asarray(b2, jnp.float32).reshape(1, -1)
    return dict(w1=w1_t, b1=b1_2d, w2=w2_t, b2=b2_2d)


@functools.partial(jax.jit, static_argnames=("apply_softmax", "tile_b"))
def _mlp_forward_jit(x, w1, b1, w2, b2, *, apply_softmax, tile_b):
    B, D_in = x.shape
    H, D_out = w2.shape

    # Batch tile: multiple of 8 sublanes, capped so the grid has >= 2 steps when the
    # batch permits (v7x megacore sharding via dimension_semantics=("parallel",)).
    half = _round_up(pl.cdiv(B, 2), 8)
    tb = max(8, min(tile_b, half))
    grid_b = pl.cdiv(B, tb)          # ragged edge block is masked by Pallas (no pad)

    kernel = functools.partial(_mlp_kernel, apply_softmax=apply_softmax)

    out = pl.pallas_call(
        kernel,
        out_shape=jax.ShapeDtypeStruct((B, D_out), jnp.float32),
        grid=(grid_b,),
        in_specs=[
            pl.BlockSpec((tb, D_in), lambda b: (b, 0)),      # activations: pipelined
            pl.BlockSpec((D_in, H), lambda b: (0, 0)),       # weights: VMEM-resident
            pl.BlockSpec((1, H), lambda b: (0, 0)),
            pl.BlockSpec((H, D_out), lambda b: (0, 0)),
            pl.BlockSpec((1, D_out), lambda b: (0, 0)),
        ],
        out_specs=pl.BlockSpec((tb, D_out), lambda b: (b, 0)),   # narrow output store
        compiler_params=pltpu.CompilerParams(
            dimension_semantics=("parallel",)),   # megacore-shard batch on v7x
    )(x, w1, b1, w2, b2)

    return out


def mlp_forward(x, params, apply_softmax=False, tile_b=1024):
    """x: (B, D_in) float32; params: output of prepare_mlp_params()."""
    return _mlp_forward_jit(
        x, params["w1"], params["b1"], params["w2"], params["b2"],
        apply_softmax=apply_softmax, tile_b=tile_b)


if __name__ == "__main__":
    # Deterministic synthetic params/inputs (no checkpoint loading).
    batch, input_dims, hidden_dims, output_dims = 2, 16, 32, 4

    key = jax.random.PRNGKey(0)
    kx, kw1, kb1, kw2, kb2, kxb, kxr = jax.random.split(key, 7)

    x = jax.random.normal(kx, (batch, input_dims), dtype=jnp.float32)
    # nn.Linear stores weight as (out_features, in_features)
    w1 = jax.random.normal(kw1, (hidden_dims, input_dims), dtype=jnp.float32) * 0.1
    b1 = jax.random.normal(kb1, (hidden_dims,), dtype=jnp.float32) * 0.1
    w2 = jax.random.normal(kw2, (output_dims, hidden_dims), dtype=jnp.float32) * 0.1
    b2 = jax.random.normal(kb2, (output_dims,), dtype=jnp.float32) * 0.1

    # Reference in plain JAX (matches PyTorch forward semantics).
    def ref_fwd(xi):
        h = jnp.maximum(xi @ w1.T + b1, 0.0)
        return h @ w2.T + b2

    ref_out = ref_fwd(x)
    ref_sm = jax.nn.softmax(ref_out, axis=1)

    # --- f32 matmul path: strict correctness check --------------------------
    params_f32 = prepare_mlp_params(w1, b1, w2, b2, matmul_dtype=jnp.float32)
    out = jax.block_until_ready(mlp_forward(x, params_f32, apply_softmax=False))
    out_sm = jax.block_until_ready(mlp_forward(x, params_f32, apply_softmax=True))
    assert out.shape == (batch, output_dims)
    assert out_sm.shape == (batch, output_dims)
    assert jnp.allclose(out, ref_out, atol=1e-4, rtol=1e-4)
    assert jnp.allclose(out_sm, ref_sm, atol=1e-4, rtol=1e-4)

    # --- bf16 matmul path (default; MXU-friendly): loose tolerance -----------
    params_bf16 = prepare_mlp_params(w1, b1, w2, b2, matmul_dtype=jnp.bfloat16)
    out_bf = jax.block_until_ready(mlp_forward(x, params_bf16, apply_softmax=False))
    assert out_bf.shape == (batch, output_dims)
    assert jnp.allclose(out_bf, ref_out, atol=5e-2, rtol=5e-2)

    # --- larger batch exercises the tiled / pipelined / multi-step grid path ---
    big_batch = 512
    xb = jax.random.normal(kxb, (big_batch, input_dims), dtype=jnp.float32)
    ref_big = ref_fwd(xb)
    out_big = jax.block_until_ready(mlp_forward(xb, params_f32, apply_softmax=False))
    assert out_big.shape == (big_batch, output_dims)
    assert jnp.allclose(out_big, ref_big, atol=1e-4, rtol=1e-4)

    # --- ragged batch (not a multiple of the tile) exercises the masked edge ---
    rag_batch = 1000
    xr = jax.random.normal(kxr, (rag_batch, input_dims), dtype=jnp.float32)
    ref_rag = jax.nn.softmax(ref_fwd(xr), axis=1)
    out_rag = jax.block_until_ready(mlp_forward(xr, params_f32, apply_softmax=True))
    assert out_rag.shape == (rag_batch, output_dims)
    assert jnp.allclose(out_rag, ref_rag, atol=1e-4, rtol=1e-4)

    print("KERNEL_OK")
</pallas_src>

<mosaic_0001>
module attributes {stable_mosaic.version = 11 : i64} {
  func.func @_mlp_kernel(%arg0: i32, %arg1: memref<8x16xf32, #tpu.memory_space<vmem>>, %arg2: memref<16x32xf32, #tpu.memory_space<vmem>>, %arg3: memref<1x32xf32, #tpu.memory_space<vmem>>, %arg4: memref<32x4xf32, #tpu.memory_space<vmem>>, %arg5: memref<1x4xf32, #tpu.memory_space<vmem>>, %arg6: memref<8x4xf32, #tpu.memory_space<vmem>>) attributes {dimension_semantics = [#tpu.dimension_semantics<parallel>], iteration_bounds = array<i64: 1>, scalar_prefetch = 0 : i64, scratch_operands = 0 : i64, tpu.core_type = #tpu.core_type<tc>, window_params = [{transform_indices = @transform_0, window_bounds = array<i64: 8, 16>}, {pipeline_mode = #tpu.pipeline_mode<synchronous>, transform_indices = @transform_1, window_bounds = array<i64: 16, 32>}, {pipeline_mode = #tpu.pipeline_mode<synchronous>, transform_indices = @transform_2, window_bounds = array<i64: 1, 32>}, {pipeline_mode = #tpu.pipeline_mode<synchronous>, transform_indices = @transform_3, window_bounds = array<i64: 32, 4>}, {pipeline_mode = #tpu.pipeline_mode<synchronous>, transform_indices = @transform_4, window_bounds = array<i64: 1, 4>}, {transform_indices = @transform_5, window_bounds = array<i64: 8, 4>}]} {
    %c0 = arith.constant 0 : index
    %c0_0 = arith.constant 0 : index
    %0 = vector.load %arg1[%c0, %c0_0] : memref<8x16xf32, #tpu.memory_space<vmem>>, vector<8x16xf32>
    %c0_1 = arith.constant 0 : index
    %c0_2 = arith.constant 0 : index
    %1 = vector.load %arg2[%c0_1, %c0_2] : memref<16x32xf32, #tpu.memory_space<vmem>>, vector<16x32xf32>
    %cst = arith.constant dense<0.000000e+00> : vector<8x32xf32>
    %2 = tpu.matmul %0, %1, %cst {dimension_numbers = #tpu.dot_dimension_numbers<[1], [0], [0], [1], [0, 0, 1, 1], [], []>} : vector<8x16xf32>, vector<16x32xf32>, vector<8x32xf32> -> vector<8x32xf32>
    %c0_3 = arith.constant 0 : index
    %c0_4 = arith.constant 0 : index
    %3 = vector.load %arg3[%c0_3, %c0_4] : memref<1x32xf32, #tpu.memory_space<vmem>>, vector<1x32xf32>
    %4 = vector.broadcast %3 : vector<1x32xf32> to vector<8x32xf32>
    %5 = arith.addf %2, %4 : vector<8x32xf32>
    %cst_5 = arith.constant 0.000000e+00 : f32
    %6 = vector.broadcast %cst_5 : f32 to vector<8x32xf32>
    %7 = arith.maximumf %5, %6 : vector<8x32xf32>
    %c0_6 = arith.constant 0 : index
    %c0_7 = arith.constant 0 : index
    %8 = vector.load %arg4[%c0_6, %c0_7] : memref<32x4xf32, #tpu.memory_space<vmem>>, vector<32x4xf32>
    %cst_8 = arith.constant dense<0.000000e+00> : vector<8x4xf32>
    %9 = tpu.matmul %7, %8, %cst_8 {dimension_numbers = #tpu.dot_dimension_numbers<[1], [0], [0], [1], [0, 0, 1, 1], [], []>} : vector<8x32xf32>, vector<32x4xf32>, vector<8x4xf32> -> vector<8x4xf32>
    %c0_9 = arith.constant 0 : index
    %c0_10 = arith.constant 0 : index
    %10 = vector.load %arg5[%c0_9, %c0_10] : memref<1x4xf32, #tpu.memory_space<vmem>>, vector<1x4xf32>
    %11 = vector.broadcast %10 : vector<1x4xf32> to vector<8x4xf32>
    %12 = arith.addf %9, %11 : vector<8x4xf32>
    %c0_11 = arith.constant 0 : index
    %c0_12 = arith.constant 0 : index
    %13 = vector.load %arg6[%c0_11, %c0_12] : memref<8x4xf32, #tpu.memory_space<vmem>>, vector<8x4xf32>
    tpu.vector_store %arg6[%c0_11, %c0_12], %12 {strides = array<i32>} : memref<8x4xf32, #tpu.memory_space<vmem>>, vector<8x4xf32>,
    return
  }
  func.func @transform_0(%arg0: i32) -> (i32, i32) {
    %c0_i32 = arith.constant 0 : i32
    %c0_i32_0 = arith.constant 0 : i32
    return %arg0, %c0_i32 : i32, i32
  }
  func.func @transform_1(%arg0: i32) -> (i32, i32) {
    %c0_i32 = arith.constant 0 : i32
    %c0_i32_0 = arith.constant 0 : i32
    %c0_i32_1 = arith.constant 0 : i32
    return %c0_i32, %c0_i32_0 : i32, i32
  }
  func.func @transform_2(%arg0: i32) -> (i32, i32) {
    %c0_i32 = arith.constant 0 : i32
    %c0_i32_0 = arith.constant 0 : i32
    %c0_i32_1 = arith.constant 0 : i32
    return %c0_i32, %c0_i32_0 : i32, i32
  }
  func.func @transform_3(%arg0: i32) -> (i32, i32) {
    %c0_i32 = arith.constant 0 : i32
    %c0_i32_0 = arith.constant 0 : i32
    %c0_i32_1 = arith.constant 0 : i32
    return %c0_i32, %c0_i32_0 : i32, i32
  }
  func.func @transform_4(%arg0: i32) -> (i32, i32) {
    %c0_i32 = arith.constant 0 : i32
    %c0_i32_0 = arith.constant 0 : i32
    %c0_i32_1 = arith.constant 0 : i32
    return %c0_i32, %c0_i32_0 : i32, i32
  }
  func.func @transform_5(%arg0: i32) -> (i32, i32) {
    %c0_i32 = arith.constant 0 : i32
    %c0_i32_0 = arith.constant 0 : i32
    return %arg0, %c0_i32 : i32, i32
  }
}

</mosaic_0001>

<bundles_post_ra>
// kernel: _mlp_forward_jit.1
= control target key start
LH: loop header
LB: loop body
LE: loop exit
PB: predicated region body
PF: predicated region fallthrough
CT: control target
= control target key end

     0   :  { %10 = vsyncpa [#allocation3], 0  ;;  %v278_v2 = vmov 0.0|0.0   ;;  %vm279_vm0 = vmmov 0   ;;  %v280_v6 = vmov 0.0   ;;  %vm31_vm1 = vcmask 130048   ;;  %s353_s0 = inlined_call_operand.vmem [shape: f32[2,16], index: 0, kind: input, shape index: {}]   ;;  %s354_s1 = inlined_call_operand.vmem [shape: f32[16,32], index: 1, kind: input, shape index: {}]   ;;  %s355_s2 = inlined_call_operand.vmem [shape: f32[1,32], index: 2, kind: input, shape index: {}]   ;;  %s356_s3 = inlined_call_operand.vmem [shape: f32[32,4], index: 3, kind: input, shape index: {}]   ;;  %s357_s4 = inlined_call_operand.vmem [shape: f32[1,4], index: 4, kind: input, shape index: {}]   ;;  %s358_s5 = inlined_call_operand.hbm [shape: f32[2,4], index: 5, kind: output, shape index: {}]  }
   0x1   :  { %v22_v0 = vld [vmem:[%s354_s1] sm:$0xff]  ;;  %v23_v1 = vld [vmem:[%s354_s1 + $0x8] sm:$0xff]  ;;  %239 = vmatprep.subr.bf16.mxu0 %v278_v2  ;;  %242 = vmatprep.subr.bf16.mxu1 %v278_v2  ;;  %v108_v9 = vld [vmem:[%s356_s3 + $0x10] sm:$0xff]  ;;  %vm117_vm2 = vcmask 261120   ;;  %vm191_vm3 = vcmask 31744  }
   0x2   :  { %v240_v3 = vpack.c.bf16 %v23_v1, %v22_v0  ;;  %v106_v4 = vld [vmem:[%s356_s3] sm:$0xff]  ;;  %v107_v5 = vld [vmem:[%s356_s3 + $0x8] sm:$0xff]  ;;  %225 = vmatprep.mubr.msk.f32.mxu0 %vm279_vm0, %v280_v6  ;;  %236 = vmatprep.mubr.msk.f32.mxu1 %vm279_vm0, %v280_v6  ;;  %v109_v10 = vld [vmem:[%s356_s3 + $0x18] sm:$0xff] }
   0x3   :  { %v243_v7 = vpack.c.bf16 %v107_v5, %v106_v4  ;;  %v21_v8 = vld [vmem:[%s353_s0] sm:$0xff]  ;;  %v246_v11 = vpack.c.bf16 %v109_v10, %v108_v9 }
   0x4   :  { %241 = vmatpush3.bf16.msra.mxu0 %v240_v3  ;;  %v209_v12 = vld [vmem:[%s355_s2] ss:$0 sm:$0xff] }
   0x5   :  { %244 = vmatpush3.bf16.msra.mxu1 %v243_v7  ;;  %v211_v17 = vld [vmem:[%s357_s4] ss:$0 sm:$0xff] }
   0x6   :  { %245 = vmatprep.subr.bf16.mxu1 %v278_v2 }
   0x7   :  { %226 = vmatmul.mubr.msk.f32.vlgmr.msra.gmra.mrb[0].mxu0 %vm31_vm1, %v21_v8 }
   0x9   :  { %247 = vmatpush3.bf16.msra.mxu1 %v246_v11 }
  0xda   :  { %v101_v13 = vpop.f32.mrb[0].mxu0 }
  0xdb   :  { %v102_v14 = vadd.f32 %v209_v12, %v101_v13  ;;  %v227_v15 = vpop.f32.mrb[1].mxu0 }
  0xdd   :  { %v105_v16 = vmax.f32 %v102_v14, 0.0 }
  0xdf   :  { %237 = vmatmul.mubr.msk.f32.vlgmr.msra.gmra.mrb[0].mxu1 %vm117_vm2, %v105_v16 }
 0x1b2   :  { %v187_v18 = vpop.f32.mrb[0].mxu1 }
 0x1b3   :  { %v188_v19 = vadd.f32 %v211_v17, %v187_v18  ;;  %v238_v20 = vpop.f32.mrb[1].mxu1 }
 0x1b5   :  { %192 = vst.msk [vmem:[#allocation2] sm:$0xff] %vm191_vm3, %v188_v19 }
 0x1b6   :  { %197 = vsyncadd [#allocation3], 96  ;;  %s281_s3 = smov [#allocation2]  }
 0x1b7   :  { %s198_s9 = sshll.u32 %s281_s3, 4  ;;  %s199_s9 = int_to_ptr.vmem [resolvable:$true] %s198_s9 }
 0x1b8   :  { %s254_s2 = scalar_lea.vmem %s199_s9, 32  ;;  %s258_s10 = scalar_lea.vmem %s199_s9, 128 }
 0x1b9   :  { %p255_p0 = scmp.ne.s32.totalorder %s199_s9, %s254_s2  ;;  %p259_p1 = scmp.lt.s32.totalorder %s199_s9, %s199_s9 }
 0x1ba   :  { %p260_p2 = scmp.lt.s32.totalorder %s258_s10, %s254_s2 }
 0x1bc   :  { %p261_p3 = por %p260_p2, %p259_p1 }
 0x1be   :  { %p262_p4 = pnand %p261_p3, %p255_p0 }
 0x1c0   :  { %265 = shalt.err (!%p262_p4)
}
 0x1c1   :  { %s266_s4 = scalar_lea.hbm %s358_s5, 32 }
 0x1c2   :  { %p267_p5 = scmp.ne.s32.totalorder %s358_s5, %s266_s4  ;;  %p270_p6 = scmp.lt.u32.totalorder %s266_s4, %s358_s5 }
 0x1c4   :  { %p272_p7 = pnand %p270_p6, %p267_p5 }
 0x1c6   :  { %275 = shalt.err (!%p272_p7)
}
 0x1c7   :  { %s282_s17 = smov 32   ;;  %s283_s18 = smov 2  }
 0x1c8   :  { %204 = dma.vmem_to_hbm [thread:$0]  %s199_s9, 32, %s358_s5, [#allocation3], %s282_s17, %s282_s17, %s283_s18  }
 0x1c9   :  { %276 = dma.done.wait [#allocation3], 128  }
 0x1ca   :  { %277 = vsyncadd [#allocation3], 4294967168 }
 0x1cb   :  { %208 = vsyncpa [#allocation3], 1 }

</bundles_post_ra>
